<compile_context>
chip_gen: v6e
topology: v6e:2x2x1
jax: 0.10.0
libtpu: 0.0.40
codegen_flags: <defaults>
</compile_context>

<pallas_src>
import functools
import math

import jax
import jax.numpy as jnp
from jax.experimental import pallas as pl
from jax.experimental.pallas import tpu as pltpu


# ------------------------------ helpers ------------------------------------ #

def _round_up(x, m):
    return ((x + m - 1) // m) * m


def _vbytes(rows, cols, itemsize):
    """VMEM footprint of a (rows, cols) tile incl. sublane/lane padding."""
    sublane = 8 * (4 // itemsize)          # 8 for f32, 16 for bf16
    return _round_up(max(rows, 1), sublane) * _round_up(max(cols, 1), 128) * itemsize


def _tpu_vmem():
    """(physical_vmem_bytes, practical_cap_bytes) for this TPU generation."""
    try:
        phys = int(pltpu.get_tpu_info().vmem_capacity_bytes)
    except Exception:
        phys = 64 * 2**20                  # conservative fallback (v7x-sized)
    if phys <= 64 * 2**20:                 # v7x-class: 64 MiB physical VMEM
        return phys, 48 * 2**20
    return phys, 100 * 2**20               # v5e / v6e: 128 MiB physical VMEM


def _choose_tiling(n, row_tile, k_tile):
    """Pick (n_pad, tm, tk) so that tm | n_pad and tk | n_pad."""
    if row_tile is None and k_tile is None:
        n_pad = _round_up(n, 256)
        tm = 256
        tk = 256
        t = 512
        while t <= min(2048, n_pad):       # biggest 256-multiple dividing n_pad
            if n_pad % t == 0:
                tk = t
            t += 256
        return n_pad, tm, tk
    tm = row_tile if row_tile is not None else 256
    tk = k_tile if k_tile is not None else 256
    n_pad = _round_up(n, tm * tk // math.gcd(tm, tk))
    return n_pad, tm, tk


def prepare_adjacency(adj):
    """Dense 0/1 adjacency -> bf16 (exact for 0/1 entries).

    Call once per graph and reuse across place_gcn calls to avoid repeating an
    HBM round trip on the dominant O(N^2) operand.
    NOTE: bf16 is only exact for the unnormalized 0/1 adjacency that DGL's
    copy_u + sum aggregation implies; a normalized adjacency would lose bits.
    """
    adj = jnp.asarray(adj)
    return adj if adj.dtype == jnp.bfloat16 else adj.astype(jnp.bfloat16)


# ------------------------------ kernels ------------------------------------ #

def _gcn_fused_kernel(a_ref, x_ref, w1t_ref, b1_ref, w2t_ref, b2_ref, o_ref):
    """Whole 2-layer GCN on fully VMEM-resident blocks (small graphs)."""
    a = a_ref[...]                                                    # bf16 (N, N)
    # Layer 1 (reassociated): relu(A @ (x @ W1^T) + b1).
    p = jnp.dot(x_ref[...], w1t_ref[...],
                preferred_element_type=jnp.float32)                   # (N, 64) f32
    h1 = jnp.maximum(
        jnp.dot(a, p.astype(jnp.bfloat16),
                preferred_element_type=jnp.float32) + b1_ref[...], 0.0)
    # Layer 2 (reassociated): A @ (h1 @ W2^T) + b2.
    t = jnp.dot(h1, w2t_ref[...], preferred_element_type=jnp.float32)  # (N, 32)
    o_ref[...] = jnp.dot(a, t.astype(jnp.bfloat16),
                         preferred_element_type=jnp.float32) + b2_ref[...]


def _project_kernel(x_ref, w1t_ref, p_ref):
    """Prologue: P row-tile = x_tile @ W1^T, written in bf16 (computed once)."""
    p_ref[...] = jnp.dot(x_ref[...], w1t_ref[...],
                         preferred_element_type=jnp.float32).astype(p_ref.dtype)


def _agg1_kernel(a_ref, p_ref, b1_ref, w2t_ref, t_ref, acc_ref):
    """Pass 1, K-tiled: T_tile = relu(sum_k A[i,k] @ P[k] + b1) @ W2^T."""
    k = pl.program_id(1)

    @pl.when(k == 0)
    def _():
        acc_ref[...] = jnp.zeros_like(acc_ref)

    acc_ref[...] += jnp.dot(a_ref[...], p_ref[...],          # bf16 x bf16 -> f32
                            preferred_element_type=jnp.float32)

    @pl.when(k == pl.num_programs(1) - 1)
    def _():
        h1 = jnp.maximum(acc_ref[...] + b1_ref[...], 0.0)
        t_ref[...] = jnp.dot(h1, w2t_ref[...],
                             preferred_element_type=jnp.float32).astype(t_ref.dtype)


def _agg2_kernel(a_ref, t_ref, b2_ref, o_ref):
    """Pass 2, K-tiled: out_tile = sum_k A[i,k] @ T[k] + b2 (f32 accumulate)."""
    k = pl.program_id(1)

    @pl.when(k == 0)
    def _():
        o_ref[...] = jnp.broadcast_to(b2_ref[...], o_ref.shape)

    o_ref[...] += jnp.dot(a_ref[...], t_ref[...],             # bf16 x bf16 -> f32
                          preferred_element_type=jnp.float32)


# ------------------------------ wrapper ------------------------------------ #

def place_gcn(adj, x, w1, b1, w2, b2, *, mode="auto", row_tile=None, k_tile=None):
    """2-layer GCN forward.

    adj: (N, N) dense 0/1 adjacency (dst, src), f32 or bf16.
    x:   (N, in_feats) f32.
    w1: (64, in_feats), b1: (64,), w2: (32, 64), b2: (32,)  (PyTorch Linear layout).
    """
    n, in_feats = x.shape
    hid, out_feats = w1.shape[0], w2.shape[0]

    adj_bf = prepare_adjacency(adj)
    x = jnp.asarray(x, jnp.float32)
    w1t = jnp.asarray(w1, jnp.float32).T                       # (F, 64)
    b1r = jnp.asarray(b1, jnp.float32).reshape(1, hid)
    w2t = jnp.asarray(w2, jnp.float32).T                       # (64, 32)
    b2r = jnp.asarray(b2, jnp.float32).reshape(1, out_feats)

    phys, cap = _tpu_vmem()

    if mode == "auto":
        # Padding-aware VMEM footprint of the fully-resident fused kernel.
        need_fused = (_vbytes(n, n, 2)                          # A bf16
                      + _vbytes(n, in_feats, 4)                 # x f32
                      + 3 * _vbytes(n, hid, 4) + _vbytes(n, hid, 2)      # P/h1
                      + 2 * _vbytes(n, out_feats, 4) + _vbytes(n, out_feats, 2)
                      + _vbytes(in_feats, hid, 4) + _vbytes(hid, out_feats, 4)
                      + _vbytes(1, hid, 4) + _vbytes(1, out_feats, 4))
        fits = int(1.3 * need_fused) <= cap
        # v7x has 2 TensorCores; the tiled path's parallel row axis shards over
        # both, so hand off earlier there.  Single-core v5e/v6e keep the fused
        # path (A read from HBM once, no T round trip) as long as VMEM fits.
        mode = "fused" if (fits and (phys > 64 * 2**20 or n <= 2048)) else "tiled"

    if mode == "fused":
        vmem = pl.BlockSpec(memory_space=pltpu.MemorySpace.VMEM)
        flops = (2 * n * in_feats * hid + 2 * n * n * hid
                 + 2 * n * hid * out_feats + 2 * n * n * out_feats)
        bytes_acc = (n * n * 2 + n * (in_feats + out_feats) * 4
                     + (in_feats * hid + hid * out_feats + hid + out_feats) * 4)
        return pl.pallas_call(
            _gcn_fused_kernel,
            out_shape=jax.ShapeDtypeStruct((n, out_feats), jnp.float32),
            in_specs=[vmem] * 6,
            out_specs=vmem,
            compiler_params=pltpu.CompilerParams(vmem_limit_bytes=cap),
            cost_estimate=pl.CostEstimate(flops=flops, transcendentals=0,
                                          bytes_accessed=bytes_acc),
        )(adj_bf, x, w1t, b1r, w2t, b2r)

    # ------------------- row + K tiled path (large / ragged N) -------------- #
    n_pad, tm, tk = _choose_tiling(n, row_tile, k_tile)
    pad = n_pad - n
    if pad:
        adj_bf = jnp.pad(adj_bf, ((0, pad), (0, pad)))          # zero rows/cols: exact
        x = jnp.pad(x, ((0, pad), (0, 0)))

    grid_rows, grid_k = n_pad // tm, n_pad // tk

    # Prologue: P = x @ W1^T computed ONCE (not per A row tile), stored bf16.
    tp = 256 if n_pad % 256 == 0 else (128 if n_pad % 128 == 0 else n_pad)
    p_arr = pl.pallas_call(
        _project_kernel,
        out_shape=jax.ShapeDtypeStruct((n_pad, hid), jnp.bfloat16),
        grid=(n_pad // tp,),
        in_specs=[pl.BlockSpec((tp, in_feats), lambda i: (i, 0)),
                  pl.BlockSpec((in_feats, hid), lambda i: (0, 0))],
        out_specs=pl.BlockSpec((tp, hid), lambda i: (i, 0)),
        compiler_params=pltpu.CompilerParams(
            dimension_semantics=("parallel",), vmem_limit_bytes=cap),
        cost_estimate=pl.CostEstimate(
            flops=2 * n_pad * in_feats * hid, transcendentals=0,
            bytes_accessed=n_pad * in_feats * 4 + in_feats * hid * 4 + n_pad * hid * 2),
    )(x, w1t)

    sem = pltpu.CompilerParams(dimension_semantics=("parallel", "arbitrary"),
                               vmem_limit_bytes=cap)

    # Pass 1: T = relu(A @ P + b1) @ W2^T, bf16 output (operand for pass 2).
    t_arr = pl.pallas_call(
        _agg1_kernel,
        out_shape=jax.ShapeDtypeStruct((n_pad, out_feats), jnp.bfloat16),
        grid=(grid_rows, grid_k),
        in_specs=[pl.BlockSpec((tm, tk), lambda i, k: (i, k)),          # A tile (bf16)
                  pl.BlockSpec((tk, hid), lambda i, k: (k, 0)),         # P tile (bf16)
                  pl.BlockSpec((1, hid), lambda i, k: (0, 0)),          # b1
                  pl.BlockSpec((hid, out_feats), lambda i, k: (0, 0))], # W2^T
        out_specs=pl.BlockSpec((tm, out_feats), lambda i, k: (i, 0)),
        scratch_shapes=[pltpu.VMEM((tm, hid), jnp.float32)],
        compiler_params=sem,
        cost_estimate=pl.CostEstimate(
            flops=2 * n_pad * n_pad * hid + 2 * n_pad * hid * out_feats,
            transcendentals=0,
            bytes_accessed=n_pad * n_pad * 2 + n_pad * hid * 2 + n_pad * out_feats * 2),
    )(adj_bf, p_arr, b1r, w2t)

    # Pass 2: out = A @ T + b2 (accumulated directly in the f32 output block).
    out = pl.pallas_call(
        _agg2_kernel,
        out_shape=jax.ShapeDtypeStruct((n_pad, out_feats), jnp.float32),
        grid=(grid_rows, grid_k),
        in_specs=[pl.BlockSpec((tm, tk), lambda i, k: (i, k)),          # A tile (bf16)
                  pl.BlockSpec((tk, out_feats), lambda i, k: (k, 0)),   # T tile (bf16)
                  pl.BlockSpec((1, out_feats), lambda i, k: (0, 0))],   # b2 only
        out_specs=pl.BlockSpec((tm, out_feats), lambda i, k: (i, 0)),
        compiler_params=sem,
        cost_estimate=pl.CostEstimate(
            flops=2 * n_pad * n_pad * out_feats, transcendentals=0,
            bytes_accessed=(n_pad * n_pad * 2 + n_pad * out_feats * 2
                            + n_pad * out_feats * 4)),
    )(adj_bf, t_arr, b2r)

    return out[:n] if pad else out


# ------------------------------ reference / demo ---------------------------- #

def _torch_linear_init(key, out_feats, in_feats):
    # Mimics torch.nn.Linear default init: U(-1/sqrt(in), 1/sqrt(in)).
    kw, kb = jax.random.split(key)
    bound = 1.0 / jnp.sqrt(jnp.float32(in_feats))
    w = jax.random.uniform(kw, (out_feats, in_feats), jnp.float32, -bound, bound)
    b = jax.random.uniform(kb, (out_feats,), jnp.float32, -bound, bound)
    return w, b


def reference_forward(adj, x, w1, b1, w2, b2):
    hp = jax.lax.Precision.HIGHEST
    a = jnp.asarray(adj, jnp.float32)
    h = jnp.dot(a, x, precision=hp)
    h = jnp.maximum(jnp.dot(h, w1.T, precision=hp) + b1, 0.0)
    h = jnp.dot(a, h, precision=hp)
    return jnp.dot(h, w2.T, precision=hp) + b2


def _max_rel_err(out, ref):
    return float(jnp.max(jnp.abs(out - ref)) / (jnp.max(jnp.abs(ref)) + 1e-6))


if __name__ == "__main__":
    H1, H2 = 64, 32          # fixed by PlaceGCN

    def make_problem(key, n, in_feats):
        k_adj, k_x, k_l1, k_l2 = jax.random.split(key, 4)
        adj = jax.random.bernoulli(k_adj, p=0.3, shape=(n, n)).astype(jnp.float32)
        x = jax.random.normal(k_x, (n, in_feats), jnp.float32)
        w1, b1 = _torch_linear_init(k_l1, H1, in_feats)
        w2, b2 = _torch_linear_init(k_l2, H2, H1)
        return adj, x, w1, b1, w2, b2

    key = jax.random.PRNGKey(0)
    k_small, k_large = jax.random.split(key)

    # Spec-sized graph (N=16, in_feats=16): fused single-launch path.
    args = make_problem(k_small, 16, 16)
    out = jax.block_until_ready(jax.jit(place_gcn)(*args))
    ref = reference_forward(*args)
    assert out.shape == (16, H2)
    assert _max_rel_err(out, ref) < 2e-2, _max_rel_err(out, ref)

    # Ragged larger graph (N=200, in_feats=24): row + K tiled path with padding.
    args = make_problem(k_large, 200, 24)
    tiled_fn = jax.jit(functools.partial(place_gcn, mode="tiled",
                                         row_tile=128, k_tile=128))
    out = jax.block_until_ready(tiled_fn(*args))
    ref = reference_forward(*args)
    assert out.shape == (200, H2)
    assert _max_rel_err(out, ref) < 2e-2, _max_rel_err(out, ref)

    print("KERNEL_OK")
</pallas_src>

<mosaic_0001>
module attributes {stable_mosaic.version = 11 : i64} {
  func.func @_gcn_fused_kernel(%arg0: memref<16x16xbf16, #tpu.memory_space<vmem>>, %arg1: memref<16x16xf32, #tpu.memory_space<vmem>>, %arg2: memref<16x64xf32, #tpu.memory_space<vmem>>, %arg3: memref<1x64xf32, #tpu.memory_space<vmem>>, %arg4: memref<64x32xf32, #tpu.memory_space<vmem>>, %arg5: memref<1x32xf32, #tpu.memory_space<vmem>>, %arg6: memref<16x32xf32, #tpu.memory_space<vmem>>) attributes {dimension_semantics = [], scalar_prefetch = 0 : i64, scratch_operands = 0 : i64, tpu.core_type = #tpu.core_type<tc>} {
    %c0 = arith.constant 0 : index
    %c0_0 = arith.constant 0 : index
    %0 = vector.load %arg0[%c0, %c0_0] : memref<16x16xbf16, #tpu.memory_space<vmem>>, vector<16x16xbf16>
    %c0_1 = arith.constant 0 : index
    %c0_2 = arith.constant 0 : index
    %1 = vector.load %arg1[%c0_1, %c0_2] : memref<16x16xf32, #tpu.memory_space<vmem>>, vector<16x16xf32>
    %c0_3 = arith.constant 0 : index
    %c0_4 = arith.constant 0 : index
    %2 = vector.load %arg2[%c0_3, %c0_4] : memref<16x64xf32, #tpu.memory_space<vmem>>, vector<16x64xf32>
    %cst = arith.constant dense<0.000000e+00> : vector<16x64xf32>
    %3 = tpu.matmul %1, %2, %cst {dimension_numbers = #tpu.dot_dimension_numbers<[1], [0], [0], [1], [0, 0, 1, 1], [], []>} : vector<16x16xf32>, vector<16x64xf32>, vector<16x64xf32> -> vector<16x64xf32>
    %4 = arith.truncf %3 : vector<16x64xf32> to vector<16x64xbf16>
    %cst_5 = arith.constant dense<0.000000e+00> : vector<16x64xf32>
    %5 = tpu.matmul %0, %4, %cst_5 {dimension_numbers = #tpu.dot_dimension_numbers<[1], [0], [0], [1], [0, 0, 1, 1], [], []>} : vector<16x16xbf16>, vector<16x64xbf16>, vector<16x64xf32> -> vector<16x64xf32>
    %c0_6 = arith.constant 0 : index
    %c0_7 = arith.constant 0 : index
    %6 = vector.load %arg3[%c0_6, %c0_7] : memref<1x64xf32, #tpu.memory_space<vmem>>, vector<1x64xf32>
    %7 = vector.broadcast %6 : vector<1x64xf32> to vector<16x64xf32>
    %8 = arith.addf %5, %7 : vector<16x64xf32>
    %cst_8 = arith.constant 0.000000e+00 : f32
    %9 = vector.broadcast %cst_8 : f32 to vector<16x64xf32>
    %10 = arith.maximumf %8, %9 : vector<16x64xf32>
    %c0_9 = arith.constant 0 : index
    %c0_10 = arith.constant 0 : index
    %11 = vector.load %arg4[%c0_9, %c0_10] : memref<64x32xf32, #tpu.memory_space<vmem>>, vector<64x32xf32>
    %cst_11 = arith.constant dense<0.000000e+00> : vector<16x32xf32>
    %12 = tpu.matmul %10, %11, %cst_11 {dimension_numbers = #tpu.dot_dimension_numbers<[1], [0], [0], [1], [0, 0, 1, 1], [], []>} : vector<16x64xf32>, vector<64x32xf32>, vector<16x32xf32> -> vector<16x32xf32>
    %13 = arith.truncf %12 : vector<16x32xf32> to vector<16x32xbf16>
    %cst_12 = arith.constant dense<0.000000e+00> : vector<16x32xf32>
    %14 = tpu.matmul %0, %13, %cst_12 {dimension_numbers = #tpu.dot_dimension_numbers<[1], [0], [0], [1], [0, 0, 1, 1], [], []>} : vector<16x16xbf16>, vector<16x32xbf16>, vector<16x32xf32> -> vector<16x32xf32>
    %c0_13 = arith.constant 0 : index
    %c0_14 = arith.constant 0 : index
    %15 = vector.load %arg5[%c0_13, %c0_14] : memref<1x32xf32, #tpu.memory_space<vmem>>, vector<1x32xf32>
    %16 = vector.broadcast %15 : vector<1x32xf32> to vector<16x32xf32>
    %17 = arith.addf %14, %16 : vector<16x32xf32>
    %c0_15 = arith.constant 0 : index
    %c0_16 = arith.constant 0 : index
    %18 = vector.load %arg6[%c0_15, %c0_16] : memref<16x32xf32, #tpu.memory_space<vmem>>, vector<16x32xf32>
    tpu.vector_store %arg6[%c0_15, %c0_16], %17 {strides = array<i32>} : memref<16x32xf32, #tpu.memory_space<vmem>>, vector<16x32xf32>,
    return
  }
}

</mosaic_0001>

<bundles_post_ra>
// kernel: place_gcn.1
= control target key start
LH: loop header
LB: loop body
LE: loop exit
PB: predicated region body
PF: predicated region fallthrough
CT: control target
= control target key end

     0   :  { %vm31_vm0 = vcmask 130048   ;;  %s517_s0 = inlined_call_operand.vmem [shape: bf16[16,16], index: 0, kind: input, shape index: {}]   ;;  %s518_s1 = inlined_call_operand.vmem [shape: f32[16,16], index: 1, kind: input, shape index: {}]   ;;  %s519_s2 = inlined_call_operand.vmem [shape: f32[16,64], index: 2, kind: input, shape index: {}]   ;;  %s520_s3 = inlined_call_operand.vmem [shape: f32[1,64], index: 3, kind: input, shape index: {}]   ;;  %s521_s4 = inlined_call_operand.vmem [shape: f32[64,32], index: 4, kind: input, shape index: {}]   ;;  %s522_s5 = inlined_call_operand.vmem [shape: f32[1,32], index: 5, kind: input, shape index: {}]   ;;  %s523_s6 = inlined_call_operand.hbm [shape: f32[16,32], index: 6, kind: output, shape index: {}]  }
   0x1   :  { %v30_v0 = vld [vmem:[%s519_s2 + $0x8] sm:$0xff]  ;;  %v29_v1 = vld [vmem:[%s519_s2] sm:$0xff] }
   0x2   :  { %v27_v2 = vld [vmem:[%s518_s1] sm:$0xff]  ;;  %357 = vmatprep.subr.mxu0 %v30_v0  ;;  %v28_v3 = vld [vmem:[%s518_s1 + $0x8] sm:$0xff] }
   0x3   :  { %361 = vmatprep.mubr.msk.f32.mxu0 %vm31_vm0, %v27_v2  ;;  %358 = vmatpush3.msra.mxu0 %v30_v0 }
   0x4   :  { %11 = vsyncpa [#allocation3], 0  ;;  %359 = vmatprep.subr.mxu0 %v29_v1  ;;  %v423_v4 = vmov 0.0   ;;  %vm424_vm1 = vmmov 0   ;;  %v179_v5 = vld [vmem:[%s521_s4 + $0x38] sm:$0xff]  ;;  %v178_v6 = vld [vmem:[%s521_s4 + $0x30] sm:$0xff] }
   0x5   :  { %360 = vmatpush3.msra.mxu0 %v29_v1  ;;  %364 = vmatprep.subr.bf16.mxu1 %v423_v4  ;;  %v177_v7 = vld [vmem:[%s521_s4 + $0x28] sm:$0xff]  ;;  %v176_v8 = vld [vmem:[%s521_s4 + $0x20] sm:$0xff]  ;;  %v175_v13 = vld [vmem:[%s521_s4 + $0x18] sm:$0xff]  ;;  %vm180_vm2 = vcmask 523264   ;;  %vm311_vm3 = vcmask 261120  }
   0x6   :  { %362 = vmatmul.mubr.msk.f32.vlgmr.msra.gmra.mxu0 %vm31_vm0, %v28_v3  ;;  %366 = vmatprep.mubr.msk.bf16.mxu1 %vm424_vm1, %v423_v4  ;;  %v400_v12 = vld [vmem:[%s517_s0] sm:$0xff]   ;;  %v174_v14 = vld [vmem:[%s521_s4 + $0x10] sm:$0xff]  ;;  %v173_v15 = vld [vmem:[%s521_s4 + $0x8] sm:$0xff] }
   0x7   :  { %370 = vmatprep.subr.mxu0 %v179_v5  ;;  %v172_v16 = vld [vmem:[%s521_s4] sm:$0xff] }
   0x8   :  { %371 = vmatpush3.msra.mxu0 %v179_v5  ;;  %v332_v17 = vld [vmem:[%s520_s3] ss:$0 sm:$0xff]  ;;  %s425_s3 = smov [#allocation2]  }
   0x9   :  { %372 = vmatprep.subr.mxu0 %v178_v6  ;;  %v337_v29 = vld [vmem:[%s522_s5] ss:$0 sm:$0xff]  ;;  %s319_s23 = sshll.u32 %s425_s3, 4  ;;  %s320_s23 = int_to_ptr.vmem [resolvable:$true] %s319_s23 }
   0xa   :  { %373 = vmatpush3.msra.mxu0 %v178_v6  ;;  %s401_s24 = scalar_lea.vmem %s320_s23, 256  ;;  %p406_p1 = scmp.lt.s32.totalorder %s320_s23, %s320_s23 }
   0xb   :  { %374 = vmatprep.subr.mxu0 %v177_v7  ;;  %p402_p0 = scmp.ne.s32.totalorder %s320_s23, %s401_s24  ;;  %p407_p2 = scmp.lt.s32.totalorder %s401_s24, %s401_s24 }
   0xc   :  { %375 = vmatpush3.msra.mxu0 %v177_v7 }
   0xd   :  { %376 = vmatprep.subr.mxu0 %v176_v8  ;;  %p408_p3 = por %p407_p2, %p406_p1 }
   0xe   :  { %377 = vmatpush3.msra.mxu0 %v176_v8 }
   0xf   :  { %378 = vmatprep.subr.mxu0 %v175_v13  ;;  %p409_p4 = pnand %p408_p3, %p402_p0 }
  0x10   :  { %379 = vmatpush3.msra.mxu0 %v175_v13 }
  0x11   :  { %380 = vmatprep.subr.mxu0 %v174_v14 }
  0x12   :  { %381 = vmatpush3.msra.mxu0 %v174_v14 }
  0x13   :  { %382 = vmatprep.subr.mxu0 %v173_v15 }
  0x14   :  { %383 = vmatpush3.msra.mxu0 %v173_v15 }
  0x15   :  { %384 = vmatprep.subr.mxu0 %v172_v16 }
  0x16   :  { %385 = vmatpush3.msra.mxu0 %v172_v16 }
  0xc6   :  { %v363_v9 = vpop.f32.mrf.mxu0 }
  0xc8   :  { %v104_v10 = vpop.f32.mrf.mxu0 }
  0xc9   :  { %v113_v11 = vpack.c.bf16 %v363_v9, %v104_v10 }
  0xcb   :  { %365 = vmatpush3.bf16.msra.mxu1 %v113_v11 }
  0xcc   :  { %389 = vmatprep.subr.bf16.mxu1 %v423_v4 }
  0xce   :  { %367 = vmatmul.mubr.msk.bf16.vlgmr.msra.gmra.mxu1 %vm31_vm0, %v400_v12 }
  0xcf   :  { %391 = vmatprep.mubr.msk.bf16.mxu1 %vm424_vm1, %v423_v4 }
 0x18e   :  { %v163_v18 = vpop.f32.mrf.mxu1 }
 0x18f   :  { %v164_v19 = vadd.f32 %v332_v17, %v163_v18 }
 0x190   :  { %v368_v20 = vpop.f32.mrf.mxu1 }
 0x191   :  { %v170_v21 = vmax.f32 %v164_v19, 0.0 }
 0x192   :  { %v166_v22 = vpop.f32.mrf.mxu1 }
 0x193   :  { %v167_v23 = vadd.f32 %v332_v17, %v166_v22  ;;  %386 = vmatprep.mubr.msk.f32.mxu0 %vm180_vm2, %v170_v21 }
 0x194   :  { %v369_v24 = vpop.f32.mrf.mxu1 }
 0x195   :  { %v171_v25 = vmax.f32 %v167_v23, 0.0 }
 0x197   :  { %387 = vmatmul.mubr.msk.f32.vlgmr.msra.gmra.mxu0 %vm180_vm2, %v171_v25 }
 0x257   :  { %v388_v26 = vpop.f32.mrf.mxu0 }
 0x259   :  { %v253_v27 = vpop.f32.mrf.mxu0 }
 0x25a   :  { %v262_v28 = vpack.c.bf16 %v388_v26, %v253_v27 }
 0x25c   :  { %390 = vmatpush3.bf16.msra.mxu1 %v262_v28 }
 0x25f   :  { %392 = vmatmul.mubr.msk.bf16.vlgmr.msra.gmra.mxu1 %vm31_vm0, %v400_v12 }
 0x31f   :  { %v304_v30 = vpop.f32.mrf.mxu1 }
 0x320   :  { %v305_v31 = vadd.f32 %v337_v29, %v304_v30 }
 0x321   :  { %v393_v32 = vpop.f32.mrf.mxu1 }
 0x322   :  { %312 = vst.msk [vmem:[#allocation2] sm:$0xff] %vm311_vm3, %v305_v31 }
 0x323   :  { %v307_v33 = vpop.f32.mrf.mxu1 }
 0x324   :  { %v308_v34 = vadd.f32 %v337_v29, %v307_v33 }
 0x325   :  { %v394_v35 = vpop.f32.mrf.mxu1 }
 0x326   :  { %313 = vst.msk [vmem:[#allocation2 + $0x8] sm:$0xff] %vm311_vm3, %v308_v34 }
 0x327   :  { %412 = shalt.err (!%p409_p4)
}
 0x328   :  { %s426_s5 = smov 128   ;;  %s427_s25 = smov 8  }
 0x329   :  { %325 = dma.vmem_to_hbm [thread:$0]  %s320_s23, 256, %s523_s6, [#allocation3], %s426_s5, %s426_s5, %s427_s25  }
 0x32a   :  { %421 = dma.done.wait [#allocation3], 256  }
 0x32b   :  { %422 = vsyncadd [#allocation3], 4294967040 }
 0x32c   :  { %329 = vsyncpa [#allocation3], 1 }

</bundles_post_ra>
